<compile_context>
chip_gen: v7x
topology: tpu7x:2x2x1
jax: 0.10.0
libtpu: 0.0.40
codegen_flags: <defaults>
</compile_context>

<pallas_src>
import jax
import jax.numpy as jnp
from jax.experimental import pallas as pl
from jax.experimental.pallas import tpu as pltpu


def _round_up(x, m):
    return ((x + m - 1) // m) * m


_TILE_CANDIDATES = (128, 256, 512, 1024, 2048, 4096)


def _select_batch_tile(B, max_tile):
    """Pick a batch tile from a small fixed set (limits recompiles) such that
    the grid has >=2 steps whenever B > one tile (v7x: both TensorCores used)."""
    for tb in _TILE_CANDIDATES:
        if tb >= max_tile:
            return max_tile
        if 2 * tb >= B:
            return tb
    return max_tile


def qnetwork_kernel(x_ref,
                    w1_ref, b1_ref,
                    w2_ref, b2_ref,
                    w3_ref, b3_ref,
                    w4t_ref, b4_ref,
                    out_ref):
    """One batch tile of the fused 4-layer MLP (intermediates stay in VMEM)."""
    cdt = w1_ref.dtype                    # compute dtype (bf16 by default)
    x = x_ref[...].astype(cdt)            # in-kernel cast: no extra HBM pass

    # fc1 + relu
    h = jnp.dot(x, w1_ref[...], preferred_element_type=jnp.float32)
    h = jnp.maximum(h + b1_ref[...], 0.0).astype(cdt)
    # fc2 + relu
    h = jnp.dot(h, w2_ref[...], preferred_element_type=jnp.float32)
    h = jnp.maximum(h + b2_ref[...], 0.0).astype(cdt)
    # fc3 + relu
    h = jnp.dot(h, w3_ref[...], preferred_element_type=jnp.float32)
    h = jnp.maximum(h + b3_ref[...], 0.0).astype(cdt)
    # fc4 computed transposed: out^T = W4^T @ h^T  ->  (A_pad sublanes, TB lanes)
    o = jnp.dot(w4t_ref[...], h.T, preferred_element_type=jnp.float32)
    out_ref[...] = (o + b4_ref[...]).astype(out_ref.dtype)


def qnetwork_forward(x, params, *, max_batch_tile=2048,
                     compute_dtype=jnp.bfloat16):
    """x: (B, state_size) f32. params: (in,out) weights + (1,out) biases.
    Returns (B, action_size) f32 Q-values."""
    B, S = x.shape
    H1 = params["w1"].shape[1]   # 128
    H2 = params["w2"].shape[1]   # 256
    H3 = params["w3"].shape[1]   # 128
    A = params["w4"].shape[1]    # action_size

    TB = _select_batch_tile(B, max_batch_tile)
    grid = (pl.cdiv(B, TB),)     # ragged last block: OOB rows are garbage-in,
                                 # masked-out on the output store (rows independent)

    # Transposed last layer: weight (A_pad, H3), bias as a column (A_pad, 1).
    A_pad = _round_up(A, 8)
    w4t = params["w4"].T
    b4c = params["b4"].reshape(A, 1)
    if A_pad != A:
        w4t = jnp.pad(w4t, ((0, A_pad - A), (0, 0)))
        b4c = jnp.pad(b4c, ((0, A_pad - A), (0, 0)))

    cdt, f32 = compute_dtype, jnp.float32
    operands = (
        x,                                                    # cast in-kernel
        params["w1"].astype(cdt), params["b1"].astype(f32),
        params["w2"].astype(cdt), params["b2"].astype(f32),
        params["w3"].astype(cdt), params["b3"].astype(f32),
        w4t.astype(cdt), b4c.astype(f32),
    )

    const = lambda i: (0, 0)   # weights/biases: same block every step -> VMEM-resident
    in_specs = [
        pl.BlockSpec((TB, S), lambda i: (i, 0)),              # x streamed over batch
        pl.BlockSpec((S, H1), const), pl.BlockSpec((1, H1), const),
        pl.BlockSpec((H1, H2), const), pl.BlockSpec((1, H2), const),
        pl.BlockSpec((H2, H3), const), pl.BlockSpec((1, H3), const),
        pl.BlockSpec((A_pad, H3), const), pl.BlockSpec((A_pad, 1), const),
    ]
    # Output: (A_pad, B) -- batch in lanes (TB multiple of 128 => unmasked vst),
    # only A_pad (=8) sublanes written instead of 128 padded f32 lanes per row.
    out_spec = pl.BlockSpec((A_pad, TB), lambda i: (0, i))

    out_t = pl.pallas_call(
        qnetwork_kernel,
        out_shape=jax.ShapeDtypeStruct((A_pad, B), jnp.float32),
        grid=grid,
        in_specs=in_specs,
        out_specs=out_spec,
        compiler_params=pltpu.CompilerParams(
            dimension_semantics=("parallel",),
            vmem_limit_bytes=32 * 1024 * 1024),   # covers v5e's 16 MiB default
    )(*operands)

    # Tiny (A, B) readback -> (B, A); negligible vs. the old padded slab slice.
    return out_t[:A].T


def init_params(key, state_size, action_size):
    """Deterministic init. Weights stored as (in, out) = PyTorch W.T ; biases (1, out)."""
    dims = [(state_size, 128), (128, 256), (256, 128), (128, action_size)]
    params = {}
    for i, (fin, fout) in enumerate(dims, start=1):
        key, kw, kb = jax.random.split(key, 3)
        bound = 1.0 / jnp.sqrt(fin)  # mimic torch.nn.Linear default uniform init
        params[f"w{i}"] = jax.random.uniform(
            kw, (fin, fout), jnp.float32, minval=-bound, maxval=bound)
        params[f"b{i}"] = jax.random.uniform(
            kb, (1, fout), jnp.float32, minval=-bound, maxval=bound)
    return params


def reference_forward(x, params, compute_dtype=jnp.float32):
    """Pure-JAX reference with the same mixed-precision recipe as the kernel."""
    cdt = compute_dtype
    h = x.astype(cdt)
    for i in (1, 2, 3):
        h = jnp.dot(h, params[f"w{i}"].astype(cdt),
                    preferred_element_type=jnp.float32) + params[f"b{i}"]
        h = jnp.maximum(h, 0.0).astype(cdt)
    return jnp.dot(h, params["w4"].astype(cdt),
                   preferred_element_type=jnp.float32) + params["b4"]


if __name__ == "__main__":
    state_size = 16
    action_size = 8

    key = jax.random.PRNGKey(0)
    key, kx_small, kx_big = jax.random.split(key, 3)
    params = init_params(key, state_size, action_size)

    # Tiny batch (online RL inference path), f32 compute for a tight check.
    x_small = jax.random.normal(kx_small, (8, state_size), jnp.float32)
    out_small = jax.block_until_ready(
        qnetwork_forward(x_small, params, compute_dtype=jnp.float32))
    ref_small = reference_forward(x_small, params, jnp.float32)
    assert out_small.shape == (8, action_size)
    assert jnp.allclose(out_small, ref_small, atol=1e-4, rtol=1e-4)

    # Replay-sized batch, default bf16 matmul operands (f32 accumulate/bias/ReLU).
    x_big = jax.random.normal(kx_big, (1024, state_size), jnp.float32)
    out_big = jax.block_until_ready(qnetwork_forward(x_big, params))
    ref_big = reference_forward(x_big, params, jnp.bfloat16)
    assert out_big.shape == (1024, action_size)
    assert jnp.allclose(out_big, ref_big, atol=2e-2, rtol=2e-2)

    # Full-precision path on the big batch (loss-side evaluation use case).
    out_big_f32 = jax.block_until_ready(
        qnetwork_forward(x_big, params, compute_dtype=jnp.float32))
    ref_big_f32 = reference_forward(x_big, params, jnp.float32)
    assert jnp.allclose(out_big_f32, ref_big_f32, atol=1e-4, rtol=1e-4)

    print("KERNEL_OK")
</pallas_src>

<mosaic_0001>
module attributes {stable_mosaic.version = 11 : i64} {
  func.func @qnetwork_kernel(%arg0: i32, %arg1: memref<128x16xf32, #tpu.memory_space<vmem>>, %arg2: memref<16x128xf32, #tpu.memory_space<vmem>>, %arg3: memref<1x128xf32, #tpu.memory_space<vmem>>, %arg4: memref<128x256xf32, #tpu.memory_space<vmem>>, %arg5: memref<1x256xf32, #tpu.memory_space<vmem>>, %arg6: memref<256x128xf32, #tpu.memory_space<vmem>>, %arg7: memref<1x128xf32, #tpu.memory_space<vmem>>, %arg8: memref<8x128xf32, #tpu.memory_space<vmem>>, %arg9: memref<8x1xf32, #tpu.memory_space<vmem>>, %arg10: memref<8x128xf32, #tpu.memory_space<vmem>>) attributes {dimension_semantics = [#tpu.dimension_semantics<parallel>], iteration_bounds = array<i64: 1>, scalar_prefetch = 0 : i64, scratch_operands = 0 : i64, tpu.core_type = #tpu.core_type<tc>, window_params = [{transform_indices = @transform_0, window_bounds = array<i64: 128, 16>}, {pipeline_mode = #tpu.pipeline_mode<synchronous>, transform_indices = @transform_1, window_bounds = array<i64: 16, 128>}, {pipeline_mode = #tpu.pipeline_mode<synchronous>, transform_indices = @transform_2, window_bounds = array<i64: 1, 128>}, {pipeline_mode = #tpu.pipeline_mode<synchronous>, transform_indices = @transform_3, window_bounds = array<i64: 128, 256>}, {pipeline_mode = #tpu.pipeline_mode<synchronous>, transform_indices = @transform_4, window_bounds = array<i64: 1, 256>}, {pipeline_mode = #tpu.pipeline_mode<synchronous>, transform_indices = @transform_5, window_bounds = array<i64: 256, 128>}, {pipeline_mode = #tpu.pipeline_mode<synchronous>, transform_indices = @transform_6, window_bounds = array<i64: 1, 128>}, {pipeline_mode = #tpu.pipeline_mode<synchronous>, transform_indices = @transform_7, window_bounds = array<i64: 8, 128>}, {pipeline_mode = #tpu.pipeline_mode<synchronous>, transform_indices = @transform_8, window_bounds = array<i64: 8, 1>}, {transform_indices = @transform_9, window_bounds = array<i64: 8, 128>}]} {
    %c0 = arith.constant 0 : index
    %c0_0 = arith.constant 0 : index
    %0 = vector.load %arg1[%c0, %c0_0] : memref<128x16xf32, #tpu.memory_space<vmem>>, vector<128x16xf32>
    %c0_1 = arith.constant 0 : index
    %c0_2 = arith.constant 0 : index
    %1 = vector.load %arg2[%c0_1, %c0_2] : memref<16x128xf32, #tpu.memory_space<vmem>>, vector<16x128xf32>
    %cst = arith.constant dense<0.000000e+00> : vector<128x128xf32>
    %2 = tpu.matmul %0, %1, %cst {dimension_numbers = #tpu.dot_dimension_numbers<[1], [0], [0], [1], [0, 0, 1, 1], [], []>} : vector<128x16xf32>, vector<16x128xf32>, vector<128x128xf32> -> vector<128x128xf32>
    %c0_3 = arith.constant 0 : index
    %c0_4 = arith.constant 0 : index
    %3 = vector.load %arg3[%c0_3, %c0_4] : memref<1x128xf32, #tpu.memory_space<vmem>>, vector<1x128xf32>
    %4 = vector.broadcast %3 : vector<1x128xf32> to vector<128x128xf32>
    %5 = arith.addf %2, %4 : vector<128x128xf32>
    %cst_5 = arith.constant 0.000000e+00 : f32
    %6 = vector.broadcast %cst_5 : f32 to vector<128x128xf32>
    %7 = arith.maximumf %5, %6 : vector<128x128xf32>
    %c0_6 = arith.constant 0 : index
    %c0_7 = arith.constant 0 : index
    %8 = vector.load %arg4[%c0_6, %c0_7] : memref<128x256xf32, #tpu.memory_space<vmem>>, vector<128x256xf32>
    %cst_8 = arith.constant dense<0.000000e+00> : vector<128x256xf32>
    %9 = tpu.matmul %7, %8, %cst_8 {dimension_numbers = #tpu.dot_dimension_numbers<[1], [0], [0], [1], [0, 0, 1, 1], [], []>} : vector<128x128xf32>, vector<128x256xf32>, vector<128x256xf32> -> vector<128x256xf32>
    %c0_9 = arith.constant 0 : index
    %c0_10 = arith.constant 0 : index
    %10 = vector.load %arg5[%c0_9, %c0_10] : memref<1x256xf32, #tpu.memory_space<vmem>>, vector<1x256xf32>
    %11 = vector.broadcast %10 : vector<1x256xf32> to vector<128x256xf32>
    %12 = arith.addf %9, %11 : vector<128x256xf32>
    %cst_11 = arith.constant 0.000000e+00 : f32
    %13 = vector.broadcast %cst_11 : f32 to vector<128x256xf32>
    %14 = arith.maximumf %12, %13 : vector<128x256xf32>
    %c0_12 = arith.constant 0 : index
    %c0_13 = arith.constant 0 : index
    %15 = vector.load %arg6[%c0_12, %c0_13] : memref<256x128xf32, #tpu.memory_space<vmem>>, vector<256x128xf32>
    %cst_14 = arith.constant dense<0.000000e+00> : vector<128x128xf32>
    %16 = tpu.matmul %14, %15, %cst_14 {dimension_numbers = #tpu.dot_dimension_numbers<[1], [0], [0], [1], [0, 0, 1, 1], [], []>} : vector<128x256xf32>, vector<256x128xf32>, vector<128x128xf32> -> vector<128x128xf32>
    %c0_15 = arith.constant 0 : index
    %c0_16 = arith.constant 0 : index
    %17 = vector.load %arg7[%c0_15, %c0_16] : memref<1x128xf32, #tpu.memory_space<vmem>>, vector<1x128xf32>
    %18 = vector.broadcast %17 : vector<1x128xf32> to vector<128x128xf32>
    %19 = arith.addf %16, %18 : vector<128x128xf32>
    %cst_17 = arith.constant 0.000000e+00 : f32
    %20 = vector.broadcast %cst_17 : f32 to vector<128x128xf32>
    %21 = arith.maximumf %19, %20 : vector<128x128xf32>
    %c0_18 = arith.constant 0 : index
    %c0_19 = arith.constant 0 : index
    %22 = vector.load %arg8[%c0_18, %c0_19] : memref<8x128xf32, #tpu.memory_space<vmem>>, vector<8x128xf32>
    %23 = tpu.transpose %21, [1, 0] : vector<128x128xf32> -> vector<128x128xf32>
    %cst_20 = arith.constant dense<0.000000e+00> : vector<8x128xf32>
    %24 = tpu.matmul %22, %23, %cst_20 {dimension_numbers = #tpu.dot_dimension_numbers<[1], [0], [0], [1], [0, 0, 1, 1], [], []>} : vector<8x128xf32>, vector<128x128xf32>, vector<8x128xf32> -> vector<8x128xf32>
    %c0_21 = arith.constant 0 : index
    %c0_22 = arith.constant 0 : index
    %25 = vector.load %arg9[%c0_21, %c0_22] : memref<8x1xf32, #tpu.memory_space<vmem>>, vector<8x1xf32>
    %26 = vector.broadcast %25 : vector<8x1xf32> to vector<8x128xf32>
    %27 = arith.addf %24, %26 : vector<8x128xf32>
    %c0_23 = arith.constant 0 : index
    %c0_24 = arith.constant 0 : index
    %28 = vector.load %arg10[%c0_23, %c0_24] : memref<8x128xf32, #tpu.memory_space<vmem>>, vector<8x128xf32>
    tpu.vector_store %arg10[%c0_23, %c0_24], %27 {strides = array<i32>} : memref<8x128xf32, #tpu.memory_space<vmem>>, vector<8x128xf32>,
    return
  }
  func.func @transform_0(%arg0: i32) -> (i32, i32) {
    %c0_i32 = arith.constant 0 : i32
    %c0_i32_0 = arith.constant 0 : i32
    return %arg0, %c0_i32 : i32, i32
  }
  func.func @transform_1(%arg0: i32) -> (i32, i32) {
    %c0_i32 = arith.constant 0 : i32
    %c0_i32_0 = arith.constant 0 : i32
    %c0_i32_1 = arith.constant 0 : i32
    return %c0_i32, %c0_i32_0 : i32, i32
  }
  func.func @transform_2(%arg0: i32) -> (i32, i32) {
    %c0_i32 = arith.constant 0 : i32
    %c0_i32_0 = arith.constant 0 : i32
    %c0_i32_1 = arith.constant 0 : i32
    return %c0_i32, %c0_i32_0 : i32, i32
  }
  func.func @transform_3(%arg0: i32) -> (i32, i32) {
    %c0_i32 = arith.constant 0 : i32
    %c0_i32_0 = arith.constant 0 : i32
    %c0_i32_1 = arith.constant 0 : i32
    return %c0_i32, %c0_i32_0 : i32, i32
  }
  func.func @transform_4(%arg0: i32) -> (i32, i32) {
    %c0_i32 = arith.constant 0 : i32
    %c0_i32_0 = arith.constant 0 : i32
    %c0_i32_1 = arith.constant 0 : i32
    return %c0_i32, %c0_i32_0 : i32, i32
  }
  func.func @transform_5(%arg0: i32) -> (i32, i32) {
    %c0_i32 = arith.constant 0 : i32
    %c0_i32_0 = arith.constant 0 : i32
    %c0_i32_1 = arith.constant 0 : i32
    return %c0_i32, %c0_i32_0 : i32, i32
  }
  func.func @transform_6(%arg0: i32) -> (i32, i32) {
    %c0_i32 = arith.constant 0 : i32
    %c0_i32_0 = arith.constant 0 : i32
    %c0_i32_1 = arith.constant 0 : i32
    return %c0_i32, %c0_i32_0 : i32, i32
  }
  func.func @transform_7(%arg0: i32) -> (i32, i32) {
    %c0_i32 = arith.constant 0 : i32
    %c0_i32_0 = arith.constant 0 : i32
    %c0_i32_1 = arith.constant 0 : i32
    return %c0_i32, %c0_i32_0 : i32, i32
  }
  func.func @transform_8(%arg0: i32) -> (i32, i32) {
    %c0_i32 = arith.constant 0 : i32
    %c0_i32_0 = arith.constant 0 : i32
    %c0_i32_1 = arith.constant 0 : i32
    return %c0_i32, %c0_i32_0 : i32, i32
  }
  func.func @transform_9(%arg0: i32) -> (i32, i32) {
    %c0_i32 = arith.constant 0 : i32
    %c0_i32_0 = arith.constant 0 : i32
    return %c0_i32, %arg0 : i32, i32
  }
}

</mosaic_0001>

<bundles_post_ra>
// kernel: tpu_custom_call.1
= control target key start
LH: loop header
LB: loop body
LE: loop exit
PB: predicated region body
PF: predicated region fallthrough
CT: control target
= control target key end

     0   :  { %14 = vsyncpa [#allocation3], 0  ;;  %s1582_s0 = inlined_call_operand.vmem [shape: f32[8,16], index: 0, kind: input, shape index: {}]   ;;  %s1583_s1 = inlined_call_operand.hbm [shape: f32[16,128], index: 1, kind: input, shape index: {}]   ;;  %s1584_s2 = inlined_call_operand.hbm [shape: f32[1,128], index: 2, kind: input, shape index: {}]   ;;  %s1585_s3 = inlined_call_operand.hbm [shape: f32[128,256], index: 3, kind: input, shape index: {}]   ;;  %s1586_s4 = inlined_call_operand.vmem [shape: f32[1,256], index: 4, kind: input, shape index: {}]   ;;  %s1587_s5 = inlined_call_operand.hbm [shape: f32[256,128], index: 5, kind: input, shape index: {}]   ;;  %s1588_s6 = inlined_call_operand.vmem [shape: f32[1,128], index: 6, kind: input, shape index: {}]   ;;  %s1589_s7 = inlined_call_operand.vmem [shape: f32[8,128], index: 7, kind: input, shape index: {}]   ;;  %s1590_s8 = inlined_call_operand.vmem [shape: f32[8,1], index: 8, kind: input, shape index: {}]   ;;  %s1591_s9 = inlined_call_operand.hbm [shape: f32[8,8], index: 9, kind: output, shape index: {}]  }
   0x1   :  { %15 = vsyncpa [#allocation6], 0 }
   0x2   :  { %16 = vsyncpa [#allocation9], 0 }
   0x3   :  { %17 = vsyncpa [#allocation4], 0  ;;  %s1273_s30 = smov [#allocation5]   ;;  %s1274_s11 = smov [#allocation2]  }
   0x4   :  { %s38_s10 = sshll.u32 %s1273_s30, 4  ;;  %s25_s12 = sshll.u32 %s1274_s11, 4  ;;  %s39_s10 = int_to_ptr.vmem [resolvable:$true] %s38_s10  ;;  %s1336_s12 = int_to_ptr.vmem [resolvable:$true] %s25_s12 }
   0x5   :  { %s1155_s15 = scalar_lea.hbm %s1584_s2, 16 }
   0x6   :  { %p1156_p0 = scmp.ne.s32.totalorder %s1584_s2, %s1155_s15  ;;  %p1159_p1 = scmp.lt.u32.totalorder %s1155_s15, %s1584_s2 }
   0x8   :  { %p1161_p2 = pnand %p1159_p1, %p1156_p0 }
   0xa   :  { %1164 = shalt.err (!%p1161_p2)
}
   0xb   :  { %s1165_s20 = scalar_lea.vmem %s39_s10, 16  ;;  %s1169_s21 = scalar_lea.vmem %s39_s10, 32 }
   0xc   :  { %p1166_p3 = scmp.ne.s32.totalorder %s39_s10, %s1165_s20  ;;  %p1170_p4 = scmp.lt.s32.totalorder %s39_s10, %s39_s10 }
   0xd   :  { %p1171_p5 = scmp.lt.s32.totalorder %s1169_s21, %s1165_s20 }
   0xf   :  { %p1172_p6 = por %p1171_p5, %p1170_p4 }
  0x11   :  { %p1173_p7 = pnand %p1172_p6, %p1166_p3 }
  0x13   :  { %1176 = shalt.err (!%p1173_p7)
}
  0x14   :  { %41 = dma.hbm_to_vmem [thread:$0]  %s1584_s2, 16, %s39_s10, [#allocation6]  }
  0x15   :  { %s1177_s26 = scalar_lea.hbm %s1583_s1, 256 }
  0x16   :  { %p1178_p8 = scmp.ne.s32.totalorder %s1583_s1, %s1177_s26  ;;  %p1181_p9 = scmp.lt.u32.totalorder %s1177_s26, %s1583_s1 }
  0x18   :  { %p1183_p10 = pnand %p1181_p9, %p1178_p8 }
  0x1a   :  { %1186 = shalt.err (!%p1183_p10)
}
  0x1b   :  { %s1187_s11 = scalar_lea.vmem %s1336_s12, 256  ;;  %p1192_p12 = scmp.lt.s32.totalorder %s1336_s12, %s1336_s12 }
  0x1c   :  { %p1188_p11 = scmp.ne.s32.totalorder %s1336_s12, %s1187_s11  ;;  %p1193_p13 = scmp.lt.s32.totalorder %s1187_s11, %s1187_s11 }
  0x1e   :  { %p1194_p0 = por %p1193_p13, %p1192_p12 }
  0x20   :  { %p1195_p1 = pnand %p1194_p0, %p1188_p11 }
  0x22   :  { %1198 = shalt.err (!%p1195_p1)
}
  0x23   :  { %s1275_s2 = smov 128   ;;  %s1276_s10 = smov 8  }
  0x24   :  { %31 = dma.hbm_to_vmem [thread:$0]  %s1583_s1, 256, %s1336_s12, [#allocation3], %s1275_s2, %s1275_s2, %s1276_s10  }
  0x25   :  { %s1277_s15 = smov [#allocation7]   ;;  %s1199_s19 = scalar_lea.hbm %s1585_s3, 4096 }
  0x26   :  { %s47_s16 = sshll.u32 %s1277_s15, 4  ;;  %p1200_p2 = scmp.ne.s32.totalorder %s1585_s3, %s1199_s19  ;;  %s48_s16 = int_to_ptr.vmem [resolvable:$true] %s47_s16 }
  0x27   :  { %p1203_p3 = scmp.lt.u32.totalorder %s1199_s19, %s1585_s3 }
  0x29   :  { %p1205_p4 = pnand %p1203_p3, %p1200_p2 }
  0x2b   :  { %1208 = shalt.err (!%p1205_p4)
}
  0x2c   :  { %s1209_s24 = scalar_lea.vmem %s48_s16, 4096  ;;  %p1214_p6 = scmp.lt.s32.totalorder %s48_s16, %s48_s16 }
  0x2d   :  { %p1210_p5 = scmp.ne.s32.totalorder %s48_s16, %s1209_s24  ;;  %p1215_p7 = scmp.lt.s32.totalorder %s1209_s24, %s1209_s24 }
  0x2f   :  { %p1216_p8 = por %p1215_p7, %p1214_p6 }
  0x31   :  { %p1217_p9 = pnand %p1216_p8, %p1210_p5 }
  0x33   :  { %1220 = shalt.err (!%p1217_p9)
}
  0x34   :  { %s1278_s1 = smov 256   ;;  %s1279_s12 = smov 16  }
  0x35   :  { %53 = dma.hbm_to_vmem [thread:$0]  %s1585_s3, 4096, %s48_s16, [#allocation6], %s1278_s1, %s1278_s1, %s1279_s12  }
  0x36   :  { %s1280_s27 = smov [#allocation8]   ;;  %s1221_s11 = scalar_lea.hbm %s1587_s5, 4096 }
  0x37   :  { %s61_s28 = sshll.u32 %s1280_s27, 4  ;;  %p1222_p10 = scmp.ne.s32.totalorder %s1587_s5, %s1221_s11  ;;  %s62_s28 = int_to_ptr.vmem [resolvable:$true] %s61_s28 }
  0x38   :  { %p1225_p11 = scmp.lt.u32.totalorder %s1221_s11, %s1587_s5 }
  0x3a   :  { %p1227_p12 = pnand %p1225_p11, %p1222_p10 }
  0x3c   :  { %1230 = shalt.err (!%p1227_p12)
}
  0x3d   :  { %s1231_s18 = scalar_lea.vmem %s62_s28, 4096  ;;  %p1236_p0 = scmp.lt.s32.totalorder %s62_s28, %s62_s28 }
  0x3e   :  { %p1232_p13 = scmp.ne.s32.totalorder %s62_s28, %s1231_s18  ;;  %p1237_p1 = scmp.lt.s32.totalorder %s1231_s18, %s1231_s18 }
  0x40   :  { %p1238_p2 = por %p1237_p1, %p1236_p0 }
  0x42   :  { %p1239_p3 = pnand %p1238_p2, %p1232_p13 }
  0x44   :  { %1242 = shalt.err (!%p1239_p3)
}
  0x45   :  { %67 = dma.hbm_to_vmem [thread:$0]  %s1587_s5, 4096, %s62_s28, [#allocation9], %s1275_s2, %s1275_s2, %s1276_s10  }
  0x46   :  { %1265 = dma.done.wait [#allocation3], 256  }
  0x47   :  { %1266 = vsyncadd [#allocation3], 4294967040 }
  0x48   :  { %1267 = dma.done.wait [#allocation6], 4112  }
  0x49   :  { %1268 = vsyncadd [#allocation6], 4294963184 }
  0x4a   :  { %1269 = dma.done.wait [#allocation9], 4096  }
  0x4b   :  { %1270 = vsyncadd [#allocation9], 4294963200  ;;  %vm111_vm0 = vcmask 130048   ;;  %v102_v0 = vld [vmem:[#allocation2] sm:$0xff]  ;;  %v103_v1 = vld [vmem:[#allocation2 + $0x8] sm:$0xff]  ;;  %vm1283_vm1 = vmmov 0  }
  0x4c   :  { %v86_v2 = vld [vmem:[%s1582_s0] sm:$0xff]  ;;  %v1049_v3 = vpack.c.bf16 %v103_v1, %v102_v0  ;;  %v87_v4 = vld [vmem:[%s1582_s0 + $0x8] sm:$0xff]  ;;  %v88_v5 = vld [vmem:[%s1582_s0 + $0x10] sm:$0xff]  ;;  %s1285_s25 = smov [#allocation10]  }
  0x4d   :  { %990 = vmatprep.mubr.msk.f32.mxu0 %vm111_vm0, %v86_v2  ;;  %v89_v6 = vld [vmem:[%s1582_s0 + $0x18] sm:$0xff]  ;;  %v324_v8 = vld [vmem:[#allocation7 + $0x18] sm:$0xff]  ;;  %v323_v11 = vld [vmem:[#allocation7 + $0x10] sm:$0xff]  ;;  %s842_s26 = sshll.u32 %s1285_s25, 4  ;;  %s843_s26 = int_to_ptr.vmem [resolvable:$true] %s842_s26 }
  0x4e   :  { %1050 = vmatprep.subr.bf16.mxu0 %v1049_v3  ;;  %v322_v7 = vld [vmem:[#allocation7 + $0x8] sm:$0xff]  ;;  %v321_v9 = vld [vmem:[#allocation7] sm:$0xff]  ;;  %v328_v13 = vld [vmem:[#allocation7 + $0x38] sm:$0xff]  ;;  %s1243_s27 = scalar_lea.vmem %s843_s26, 128  ;;  %p1248_p5 = scmp.lt.s32.totalorder %s843_s26, %s843_s26 }
  0x4f   :  { %1052 = vmatpush3.bf16.msra.mxu0 %v1049_v3  ;;  %v1053_v10 = vpack.c.bf16 %v324_v8, %v322_v7  ;;  %v326_v12 = vld [vmem:[#allocation7 + $0x28] sm:$0xff]  ;;  %v1055_v14 = vpack.c.bf16 %v323_v11, %v321_v9  ;;  %v325_v16 = vld [vmem:[#allocation7 + $0x20] sm:$0xff]  ;;  %v327_v17 = vld [vmem:[#allocation7 + $0x30] sm:$0xff]  ;;  %v1281_v3 = vmov 0.0   ;;  %p1244_p4 = scmp.ne.s32.totalorder %s843_s26, %s1243_s27  ;;  %p1249_p6 = scmp.lt.s32.totalorder %s1243_s27, %s1243_s27 }
  0x50   :  { %v1057_v15 = vpack.c.bf16 %v328_v13, %v326_v12  ;;  %v330_v18 = vld [vmem:[#allocation7 + $0x48] sm:$0xff]  ;;  %v332_v20 = vld [vmem:[#allocation7 + $0x58] sm:$0xff]  ;;  %v1059_v21 = vpack.c.bf16 %v327_v17, %v325_v16  ;;  %v329_v23 = vld [vmem:[#allocation7 + $0x40] sm:$0xff]  ;;  %429 = vmatprep.mubr.f32.mxu1 %v1281_v3 }
  0x51   :  { %v90_v19 = vld [vmem:[%s1582_s0 + $0x20] sm:$0xff]  ;;  %1054 = vmatprep.subr.bf16.mxu1 %v1053_v10  ;;  %v1061_v22 = vpack.c.bf16 %v332_v20, %v330_v18  ;;  %v91_v25 = vld [vmem:[%s1582_s0 + $0x28] sm:$0xff]  ;;  %v92_v28 = vld [vmem:[%s1582_s0 + $0x30] sm:$0xff]  ;;  %p1250_p7 = por %p1249_p6, %p1248_p5 }
  0x52   :  { %991 = vmatmul.mubr.msk.f32.vlgmr.msra.gmra.mrb[0].mxu0 %vm111_vm0, %v87_v4  ;;  %1056 = vmatpush1.bf16.msra.mxu1 %v1055_v14  ;;  %v331_v24 = vld [vmem:[#allocation7 + $0x50] sm:$0xff]  ;;  %v334_v26 = vld [vmem:[#allocation7 + $0x68] sm:$0xff]  ;;  %v336_v27 = vld [vmem:[#allocation7 + $0x78] sm:$0xff] }
  0x53   :  { %993 = vmatprep.mubr.msk.f32.mxu0 %vm111_vm0, %v88_v5  ;;  %1058 = vmatprep.subr.bf16.mxu1 %v1057_v15  ;;  %v1063_v29 = vpack.c.bf16 %v331_v24, %v329_v23  ;;  %v1065_v30 = vpack.c.bf16 %v336_v27, %v334_v26  ;;  %v333_v31 = vld [vmem:[#allocation7 + $0x60] sm:$0xff]  ;;  %v335_v32 = vld [vmem:[#allocation7 + $0x70] sm:$0xff]  ;;  %v338_v34 = vld [vmem:[#allocation7 + $0x88] sm:$0xff]  ;;  %p1251_p8 = pnand %p1250_p7, %p1244_p4 }
  0x54   :  { %v93_v33 = vld [vmem:[%s1582_s0 + $0x38] sm:$0xff]  ;;  %v340_v35 = vld [vmem:[#allocation7 + $0x98] sm:$0xff]  ;;  %v94_v36 = vld [vmem:[%s1582_s0 + $0x40] sm:$0xff]  ;;  %v1067_v37 = vpack.c.bf16 %v335_v32, %v333_v31 }
  0x55   :  { %v1069_v38 = vpack.c.bf16 %v340_v35, %v338_v34  ;;  %v337_v39 = vld [vmem:[#allocation7 + $0x80] sm:$0xff]  ;;  %v339_v40 = vld [vmem:[#allocation7 + $0x90] sm:$0xff]  ;;  %v342_v42 = vld [vmem:[#allocation7 + $0xa8] sm:$0xff] }
  0x56   :  { %994 = vmatmul.mubr.msk.f32.gmra.mrb[2].mxu0 %vm111_vm0, %v89_v6  ;;  %1060 = vmatpush1.bf16.msra.mxu1 %v1059_v21  ;;  %v95_v41 = vld [vmem:[%s1582_s0 + $0x48] sm:$0xff]  ;;  %v96_v44 = vld [vmem:[%s1582_s0 + $0x50] sm:$0xff]  ;;  %v1071_v45 = vpack.c.bf16 %v339_v40, %v337_v39  ;;  %v97_v49 = vld [vmem:[%s1582_s0 + $0x58] sm:$0xff] }
  0x57   :  { %996 = vmatprep.mubr.msk.f32.mxu0 %vm111_vm0, %v90_v19  ;;  %1062 = vmatprep.subr.bf16.mxu1 %v1061_v22  ;;  %v344_v43 = vld [vmem:[#allocation7 + $0xb8] sm:$0xff]  ;;  %v341_v47 = vld [vmem:[#allocation7 + $0xa0] sm:$0xff]  ;;  %v343_v48 = vld [vmem:[#allocation7 + $0xb0] sm:$0xff] }
  0x58   :  { %v1073_v46 = vpack.c.bf16 %v344_v43, %v342_v42  ;;  %v346_v50 = vld [vmem:[#allocation7 + $0xc8] sm:$0xff]  ;;  %v348_v51 = vld [vmem:[#allocation7 + $0xd8] sm:$0xff]  ;;  %v1075_v53 = vpack.c.bf16 %v343_v48, %v341_v47  ;;  %v345_v55 = vld [vmem:[#allocation7 + $0xc0] sm:$0xff] }
  0x59   :  { %v98_v52 = vld [vmem:[%s1582_s0 + $0x60] sm:$0xff]  ;;  %v1077_v54 = vpack.c.bf16 %v348_v51, %v346_v50  ;;  %v99_v57 = vld [vmem:[%s1582_s0 + $0x68] sm:$0xff]  ;;  %v100_v58 = vld [vmem:[%s1582_s0 + $0x70] sm:$0xff] }
  0x5a   :  { %997 = vmatmul.mubr.msk.f32.gmra.mrb[4].mxu0 %vm111_vm0, %v91_v25  ;;  %1064 = vmatpush1.bf16.msra.mxu1 %v1063_v29  ;;  %v347_v56 = vld [vmem:[#allocation7 + $0xd0] sm:$0xff]  ;;  %v101_v60 = vld [vmem:[%s1582_s0 + $0x78] sm:$0xff]  ;;  %v352_v62 = vld [vmem:[#allocation7 + $0xf8] sm:$0xff] }
  0x5b   :  { %999 = vmatprep.mubr.msk.f32.mxu0 %vm111_vm0, %v92_v28  ;;  %1066 = vmatprep.subr.bf16.mxu1 %v1065_v30  ;;  %v1079_v59 = vpack.c.bf16 %v347_v56, %v345_v55  ;;  %v350_v61 = vld [vmem:[#allocation7 + $0xe8] sm:$0xff]  ;;  %v349_v0 = vld [vmem:[#allocation7 + $0xe0] sm:$0xff]  ;;  %v351_v1 = vld [vmem:[#allocation7 + $0xf0] sm:$0xff] }
  0x5c   :  { %v1081_v63 = vpack.c.bf16 %v352_v62, %v350_v61  ;;  %v1083_v2 = vpack.c.bf16 %v351_v1, %v349_v0  ;;  %v574_v4 = vld [vmem:[#allocation8 + $0x80] sm:$0xff]  ;;  %v575_v5 = vld [vmem:[#allocation8 + $0x88] sm:$0xff]  ;;  %v576_v9 = vld [vmem:[#allocation8 + $0x90] sm:$0xff] }
  0x5d   :  { %v558_v6 = vld [vmem:[#allocation8] sm:$0xff]  ;;  %v1085_v7 = vpack.c.bf16 %v575_v5, %v574_v4  ;;  %v559_v8 = vld [vmem:[#allocation8 + $0x8] sm:$0xff]  ;;  %v577_v10 = vld [vmem:[#allocation8 + $0x98] sm:$0xff] }
  0x5e   :  { %1000 = vmatmul.mubr.msk.f32.gmra.mrb[6].mxu0 %vm111_vm0, %v93_v33  ;;  %1068 = vmatpush1.bf16.msra.mxu1 %v1067_v37  ;;  %v1087_v11 = vpack.c.bf16 %v559_v8, %v558_v6  ;;  %v1089_v12 = vpack.c.bf16 %v577_v10, %v576_v9  ;;  %v560_v13 = vld [vmem:[#allocation8 + $0x10] sm:$0xff]  ;;  %v561_v14 = vld [vmem:[#allocation8 + $0x18] sm:$0xff]  ;;  %v578_v15 = vld [vmem:[#allocation8 + $0xa0] sm:$0xff] }
  0x5f   :  { %1002 = vmatprep.mubr.msk.f32.mxu0 %vm111_vm0, %v94_v36  ;;  %1070 = vmatprep.subr.bf16.mxu1 %v1069_v38  ;;  %v579_v16 = vld [vmem:[#allocation8 + $0xa8] sm:$0xff]  ;;  %v1091_v17 = vpack.c.bf16 %v561_v14, %v560_v13  ;;  %v562_v19 = vld [vmem:[#allocation8 + $0x20] sm:$0xff]  ;;  %v580_v21 = vld [vmem:[#allocation8 + $0xb0] sm:$0xff] }
  0x60   :  { %1086 = vmatprep.subr.bf16.mxu0 %v1085_v7  ;;  %v1093_v18 = vpack.c.bf16 %v579_v16, %v578_v15  ;;  %v563_v20 = vld [vmem:[#allocation8 + $0x28] sm:$0xff]  ;;  %v581_v22 = vld [vmem:[#allocation8 + $0xb8] sm:$0xff]  ;;  %v564_v25 = vld [vmem:[#allocation8 + $0x30] sm:$0xff] }
  0x61   :  { %1088 = vmatpush3.bf16.msra.mxu0 %v1087_v11  ;;  %v1095_v23 = vpack.c.bf16 %v563_v20, %v562_v19  ;;  %v1097_v24 = vpack.c.bf16 %v581_v22, %v580_v21  ;;  %v565_v26 = vld [vmem:[#allocation8 + $0x38] sm:$0xff]  ;;  %v582_v27 = vld [vmem:[#allocation8 + $0xc0] sm:$0xff]  ;;  %v583_v28 = vld [vmem:[#allocation8 + $0xc8] sm:$0xff] }
  0x62   :  { %1003 = vmatmul.mubr.msk.f32.gmra.mrb[8].mxu0 %vm111_vm0, %v95_v41  ;;  %1072 = vmatpush1.bf16.msra.mxu1 %v1071_v45  ;;  %v1099_v29 = vpack.c.bf16 %v565_v26, %v564_v25  ;;  %v1101_v30 = vpack.c.bf16 %v583_v28, %v582_v27  ;;  %v566_v31 = vld [vmem:[#allocation8 + $0x40] sm:$0xff]  ;;  %v567_v32 = vld [vmem:[#allocation8 + $0x48] sm:$0xff]  ;;  %v584_v33 = vld [vmem:[#allocation8 + $0xd0] sm:$0xff] }
  0x63   :  { %1005 = vmatprep.mubr.msk.f32.mxu0 %vm111_vm0, %v96_v44  ;;  %1074 = vmatprep.subr.bf16.mxu1 %v1073_v46  ;;  %v585_v34 = vld [vmem:[#allocation8 + $0xd8] sm:$0xff]  ;;  %v1103_v35 = vpack.c.bf16 %v567_v32, %v566_v31  ;;  %v568_v37 = vld [vmem:[#allocation8 + $0x50] sm:$0xff]  ;;  %v586_v39 = vld [vmem:[#allocation8 + $0xe0] sm:$0xff] }
  0x64   :  { %1090 = vmatprep.subr.bf16.mxu0 %v1089_v12  ;;  %v1105_v36 = vpack.c.bf16 %v585_v34, %v584_v33  ;;  %v569_v38 = vld [vmem:[#allocation8 + $0x58] sm:$0xff]  ;;  %v587_v40 = vld [vmem:[#allocation8 + $0xe8] sm:$0xff]  ;;  %v588_v32 = vld [vmem:[#allocation8 + $0xf0] sm:$0xff] }
  0x65   :  { %1092 = vmatpush3.bf16.msra.mxu0 %v1091_v17  ;;  %v1107_v41 = vpack.c.bf16 %v569_v38, %v568_v37  ;;  %v1109_v42 = vpack.c.bf16 %v587_v40, %v586_v39  ;;  %v1462_v43 = vld [vmem:[#allocation5] ss:$0 sm:$0xff]  ;;  %v355_v38 = vlaneseq }
  0x66   :  { %1006 = vmatmul.mubr.msk.f32.gmra.mrb[10].mxu0 %vm111_vm0, %v97_v49  ;;  %1076 = vmatpush1.bf16.msra.mxu1 %v1075_v53  ;;  %v589_v33 = vld [vmem:[#allocation8 + $0xf8] sm:$0xff] }
  0x67   :  { %1008 = vmatprep.mubr.msk.f32.mxu0 %vm111_vm0, %v98_v52  ;;  %1078 = vmatprep.subr.bf16.mxu1 %v1077_v54  ;;  %v1113_v34 = vpack.c.bf16 %v589_v33, %v588_v32  ;;  %v356_v39 = vshrl.u32 %v355_v38, 7 }
  0x68   :  { %1094 = vmatprep.subr.bf16.mxu0 %v1093_v18 }
  0x69   :  { %1096 = vmatpush3.bf16.msra.mxu0 %v1095_v23  ;;  %v357_v40 = vsub.s32 0, %v356_v39 }
  0x6a   :  { %1009 = vmatmul.mubr.msk.f32.gmra.mrb[12].mxu0 %vm111_vm0, %v99_v57  ;;  %1080 = vmatpush1.bf16.msra.mxu1 %v1079_v59 }
  0x6b   :  { %1011 = vmatprep.mubr.msk.f32.mxu0 %vm111_vm0, %v100_v58  ;;  %1082 = vmatprep.subr.bf16.mxu1 %v1081_v63 }
  0x6c   :  { %1098 = vmatprep.subr.bf16.mxu0 %v1097_v24 }
  0x6d   :  { %1100 = vmatpush3.bf16.msra.mxu0 %v1099_v29  ;;  %v570_v29 = vld [vmem:[#allocation8 + $0x60] sm:$0xff] }
  0x6e   :  { %1012 = vmatmul.mubr.msk.f32.gmra.mrb[14].mxu0 %vm111_vm0, %v101_v60  ;;  %1084 = vmatpush1.bf16.msra.mxu1 %v1083_v2 }
  0x6f   :  { %1102 = vmatprep.subr.bf16.mxu0 %v1101_v30  ;;  %v571_v30 = vld [vmem:[#allocation8 + $0x68] sm:$0xff] }
  0x70   :  { %v1111_v31 = vpack.c.bf16 %v571_v30, %v570_v29 }
  0x71   :  { %1104 = vmatpush3.bf16.msra.mxu0 %v1103_v35  ;;  %v572_v35 = vld [vmem:[#allocation8 + $0x70] sm:$0xff] }
  0x72   :  { %1106 = vmatprep.subr.bf16.mxu0 %v1105_v36  ;;  %v573_v36 = vld [vmem:[#allocation8 + $0x78] sm:$0xff] }
  0x73   :  { %v1115_v37 = vpack.c.bf16 %v573_v36, %v572_v35 }
  0x75   :  { %1108 = vmatpush3.bf16.msra.mxu0 %v1107_v41  ;;  %v353_v41 = vld [vmem:[%s1586_s4] sm:$0x3] }
  0x76   :  { %1110 = vmatprep.subr.bf16.mxu0 %v1109_v42  ;;  %v361_v42 = vsub.s32 1, %v356_v39 }
  0x79   :  { %1112 = vmatpush3.bf16.msra.mxu0 %v1111_v31 }
  0x7a   :  { %1114 = vmatprep.subr.bf16.mxu0 %v1113_v34 }
  0x7d   :  { %1116 = vmatpush3.bf16.msra.mxu0 %v1115_v37 }
 0x125   :  { %v992_v44 = vpop.f32.mrb[0].mxu0 }
 0x126   :  { %v226_v45 = vpop.f32.mrb[1].mxu0  ;;  %v232_v47 = vadd.f32 %v992_v44, %v1462_v43  ;;  %v1500_v44 = vrot.slane %v353_v41, %v361_v42 }
 0x127   :  { %v227_v46 = vadd.f32 %v1462_v43, %v226_v45 }
 0x128   :  { %v306_v52 = vmax.f32 %v232_v47, 0.0 }
 0x129   :  { %v305_v48 = vmax.f32 %v227_v46, 0.0  ;;  %v995_v49 = vpop.f32.mrb[2].mxu0 }
 0x12a   :  { %v236_v50 = vpop.f32.mrb[3].mxu0  ;;  %v242_v56 = vadd.f32 %v995_v49, %v1462_v43 }
 0x12b   :  { %430 = vmatmul.mubr.f32.vlgmr.msra.gmra.mrb[0].mxu1 %v305_v48  ;;  %v237_v51 = vadd.f32 %v1462_v43, %v236_v50 }
 0x12c   :  { %435 = vmatprep.mubr.f32.mxu1 %v1281_v3  ;;  %v308_v60 = vmax.f32 %v242_v56, 0.0 }
 0x12d   :  { %v998_v53 = vpop.f32.mrb[4].mxu0  ;;  %v307_v55 = vmax.f32 %v237_v51, 0.0 }
 0x12e   :  { %v246_v54 = vpop.f32.mrb[5].mxu0  ;;  %v252_v0 = vadd.f32 %v998_v53, %v1462_v43 }
 0x12f   :  { %436 = vmatmul.mubr.f32.gmra.mrb[2].mxu1 %v306_v52  ;;  %v247_v59 = vadd.f32 %v1462_v43, %v246_v54 }
 0x130   :  { %441 = vmatprep.mubr.f32.mxu1 %v1281_v3  ;;  %v310_v5 = vmax.f32 %v252_v0, 0.0 }
 0x131   :  { %v1001_v57 = vpop.f32.mrb[6].mxu0  ;;  %v309_v63 = vmax.f32 %v247_v59, 0.0 }
 0x132   :  { %v256_v58 = vpop.f32.mrb[7].mxu0  ;;  %v262_v9 = vadd.f32 %v1001_v57, %v1462_v43 }
 0x133   :  { %442 = vmatmul.mubr.f32.gmra.mrb[4].mxu1 %v307_v55  ;;  %v257_v4 = vadd.f32 %v1462_v43, %v256_v58 }
 0x134   :  { %447 = vmatprep.mubr.f32.mxu1 %v1281_v3  ;;  %v312_v13 = vmax.f32 %v262_v9, 0.0 }
 0x135   :  { %v1004_v61 = vpop.f32.mrb[8].mxu0  ;;  %v311_v8 = vmax.f32 %v257_v4, 0.0 }
 0x136   :  { %v266_v62 = vpop.f32.mrb[9].mxu0  ;;  %v272_v15 = vadd.f32 %v1004_v61, %v1462_v43 }
 0x137   :  { %448 = vmatmul.mubr.f32.gmra.mrb[6].mxu1 %v308_v60  ;;  %v267_v12 = vadd.f32 %v1462_v43, %v266_v62 }
 0x138   :  { %453 = vmatprep.mubr.f32.mxu1 %v1281_v3  ;;  %v314_v17 = vmax.f32 %v272_v15, 0.0 }
 0x139   :  { %v1007_v1 = vpop.f32.mrb[10].mxu0  ;;  %v313_v14 = vmax.f32 %v267_v12, 0.0 }
 0x13a   :  { %v276_v2 = vpop.f32.mrb[11].mxu0  ;;  %v282_v19 = vadd.f32 %v1007_v1, %v1462_v43 }
 0x13b   :  { %454 = vmatmul.mubr.f32.gmra.mrb[8].mxu1 %v309_v63  ;;  %v277_v16 = vadd.f32 %v1462_v43, %v276_v2 }
 0x13c   :  { %459 = vmatprep.mubr.f32.mxu1 %v1281_v3  ;;  %v316_v21 = vmax.f32 %v282_v19, 0.0 }
 0x13d   :  { %v1010_v6 = vpop.f32.mrb[12].mxu0  ;;  %v315_v18 = vmax.f32 %v277_v16, 0.0 }
 0x13e   :  { %v286_v7 = vpop.f32.mrb[13].mxu0  ;;  %v292_v23 = vadd.f32 %v1010_v6, %v1462_v43 }
 0x13f   :  { %460 = vmatmul.mubr.f32.gmra.mrb[10].mxu1 %v310_v5  ;;  %v287_v20 = vadd.f32 %v1462_v43, %v286_v7 }
 0x140   :  { %465 = vmatprep.mubr.f32.mxu1 %v1281_v3  ;;  %v318_v25 = vmax.f32 %v292_v23, 0.0 }
 0x141   :  { %v1013_v10 = vpop.f32.mrb[14].mxu0  ;;  %v317_v22 = vmax.f32 %v287_v20, 0.0 }
 0x142   :  { %v296_v11 = vpop.f32.mrb[15].mxu0  ;;  %v302_v27 = vadd.f32 %v1013_v10, %v1462_v43 }
 0x143   :  { %466 = vmatmul.mubr.f32.gmra.mrb[12].mxu1 %v311_v8  ;;  %v297_v24 = vadd.f32 %v1462_v43, %v296_v11  ;;  %v1498_v43 = vrot.slane %v353_v41, %v357_v40 }
 0x144   :  { %471 = vmatprep.mubr.f32.mxu1 %v1281_v3  ;;  %v320_v28 = vmax.f32 %v302_v27, 0.0 }
 0x145   :  { %v319_v26 = vmax.f32 %v297_v24, 0.0 }
 0x147   :  { %472 = vmatmul.mubr.f32.gmra.mrb[14].mxu1 %v312_v13 }
 0x148   :  { %477 = vmatprep.mubr.f32.mxu1 %v1281_v3 }
 0x14b   :  { %478 = vmatmul.mubr.f32.gmra.mrb[16].mxu1 %v313_v14 }
 0x14c   :  { %483 = vmatprep.mubr.f32.mxu1 %v1281_v3 }
 0x14f   :  { %484 = vmatmul.mubr.f32.gmra.mrb[18].mxu1 %v314_v17 }
 0x150   :  { %489 = vmatprep.mubr.f32.mxu1 %v1281_v3 }
 0x153   :  { %490 = vmatmul.mubr.f32.gmra.mrb[20].mxu1 %v315_v18 }
 0x154   :  { %495 = vmatprep.mubr.f32.mxu1 %v1281_v3 }
 0x157   :  { %496 = vmatmul.mubr.f32.gmra.mrb[22].mxu1 %v316_v21 }
 0x158   :  { %501 = vmatprep.mubr.f32.mxu1 %v1281_v3 }
 0x15b   :  { %502 = vmatmul.mubr.f32.gmra.mrb[24].mxu1 %v317_v22 }
 0x15c   :  { %507 = vmatprep.mubr.f32.mxu1 %v1281_v3 }
 0x15f   :  { %508 = vmatmul.mubr.f32.gmra.mrb[26].mxu1 %v318_v25 }
 0x160   :  { %513 = vmatprep.mubr.f32.mxu1 %v1281_v3 }
 0x163   :  { %514 = vmatmul.mubr.f32.gmra.mrb[28].mxu1 %v319_v26 }
 0x164   :  { %519 = vmatprep.mubr.f32.mxu1 %v1281_v3 }
 0x167   :  { %520 = vmatmul.mubr.f32.gmra.mrb[30].mxu1 %v320_v28 }
 0x168   :  { %1046 = vmatprep.mubr.msk.f32.mxu1 %vm1283_vm1, %v1281_v3 }
 0x1fe   :  { %v431_v45 = vpop.f32.mrb[0].mxu1 }
 0x1ff   :  { %v432_v46 = vadd.f32 %v431_v45, %v1498_v43  ;;  %v433_v47 = vpop.f32.mrb[1].mxu1 }
 0x200   :  { %v434_v48 = vadd.f32 %v433_v47, %v1500_v44 }
 0x201   :  { %v526_v51 = vmax.f32 %v432_v46, 0.0 }
 0x202   :  { %v527_v49 = vmax.f32 %v434_v48, 0.0  ;;  %v437_v50 = vpop.f32.mrb[2].mxu1 }
 0x203   :  { %v438_v52 = vadd.f32 %v437_v50, %v1498_v43  ;;  %v439_v53 = vpop.f32.mrb[3].mxu1 }
 0x204   :  { %v440_v54 = vadd.f32 %v439_v53, %v1500_v44  ;;  %661 = vmatprep.mubr.f32.mxu0 %v527_v49 }
 0x205   :  { %662 = vmatmul.mubr.f32.vlgmr.msra.gmra.mrb[16].mxu0 %v526_v51  ;;  %v528_v57 = vmax.f32 %v438_v52, 0.0 }
 0x206   :  { %v529_v55 = vmax.f32 %v440_v54, 0.0  ;;  %v443_v56 = vpop.f32.mrb[4].mxu1 }
 0x207   :  { %v444_v58 = vadd.f32 %v443_v56, %v1498_v43  ;;  %v445_v59 = vpop.f32.mrb[5].mxu1 }
 0x208   :  { %v446_v60 = vadd.f32 %v445_v59, %v1500_v44  ;;  %666 = vmatprep.mubr.f32.mxu0 %v529_v55 }
 0x209   :  { %667 = vmatmul.mubr.f32.gmra.mrb[18].mxu0 %v528_v57  ;;  %v530_v63 = vmax.f32 %v444_v58, 0.0 }
 0x20a   :  { %v531_v61 = vmax.f32 %v446_v60, 0.0  ;;  %v449_v62 = vpop.f32.mrb[6].mxu1 }
 0x20b   :  { %v450_v0 = vadd.f32 %v449_v62, %v1498_v43  ;;  %v451_v1 = vpop.f32.mrb[7].mxu1 }
 0x20c   :  { %v452_v2 = vadd.f32 %v451_v1, %v1500_v44  ;;  %671 = vmatprep.mubr.f32.mxu0 %v531_v61 }
 0x20d   :  { %672 = vmatmul.mubr.f32.gmra.mrb[20].mxu0 %v530_v63  ;;  %v532_v6 = vmax.f32 %v450_v0, 0.0 }
 0x20e   :  { %v533_v4 = vmax.f32 %v452_v2, 0.0  ;;  %v455_v5 = vpop.f32.mrb[8].mxu1 }
 0x20f   :  { %v456_v7 = vadd.f32 %v455_v5, %v1498_v43  ;;  %v457_v8 = vpop.f32.mrb[9].mxu1 }
 0x210   :  { %v458_v9 = vadd.f32 %v457_v8, %v1500_v44  ;;  %676 = vmatprep.mubr.f32.mxu0 %v533_v4 }
 0x211   :  { %677 = vmatmul.mubr.f32.gmra.mrb[22].mxu0 %v532_v6  ;;  %v534_v12 = vmax.f32 %v456_v7, 0.0 }
 0x212   :  { %v535_v10 = vmax.f32 %v458_v9, 0.0  ;;  %v461_v11 = vpop.f32.mrb[10].mxu1 }
 0x213   :  { %v462_v13 = vadd.f32 %v461_v11, %v1498_v43  ;;  %v463_v14 = vpop.f32.mrb[11].mxu1 }
 0x214   :  { %v464_v15 = vadd.f32 %v463_v14, %v1500_v44  ;;  %681 = vmatprep.mubr.f32.mxu0 %v535_v10 }
 0x215   :  { %682 = vmatmul.mubr.f32.gmra.mrb[24].mxu0 %v534_v12  ;;  %v536_v18 = vmax.f32 %v462_v13, 0.0 }
 0x216   :  { %v537_v16 = vmax.f32 %v464_v15, 0.0  ;;  %v467_v17 = vpop.f32.mrb[12].mxu1 }
 0x217   :  { %v468_v19 = vadd.f32 %v467_v17, %v1498_v43  ;;  %v469_v20 = vpop.f32.mrb[13].mxu1  ;;  %v1282_v17 = vmov 0.0|0.0  }
 0x218   :  { %v470_v21 = vadd.f32 %v469_v20, %v1500_v44  ;;  %686 = vmatprep.mubr.f32.mxu0 %v537_v16  ;;  %1117 = vmatprep.subr.bf16.mxu1 %v1282_v17 }
 0x219   :  { %687 = vmatmul.mubr.f32.gmra.mrb[26].mxu0 %v536_v18  ;;  %v538_v24 = vmax.f32 %v468_v19, 0.0  ;;  %v759_v18 = vld [vmem:[%s1590_s8] sm:$0xff] }
 0x21a   :  { %v539_v22 = vmax.f32 %v470_v21, 0.0  ;;  %v473_v23 = vpop.f32.mrb[14].mxu1  ;;  %v1542_v21 = vld [vmem:[%s1588_s6] ss:$0 sm:$0xff] }
 0x21b   :  { %v474_v25 = vadd.f32 %v473_v23, %v1498_v43  ;;  %v475_v26 = vpop.f32.mrb[15].mxu1 }
 0x21c   :  { %v476_v27 = vadd.f32 %v475_v26, %v1500_v44  ;;  %691 = vmatprep.mubr.f32.mxu0 %v539_v22 }
 0x21d   :  { %692 = vmatmul.mubr.f32.gmra.mrb[28].mxu0 %v538_v24  ;;  %v540_v30 = vmax.f32 %v474_v25, 0.0 }
 0x21e   :  { %v541_v28 = vmax.f32 %v476_v27, 0.0  ;;  %v479_v29 = vpop.f32.mrb[16].mxu1 }
 0x21f   :  { %v480_v31 = vadd.f32 %v479_v29, %v1498_v43  ;;  %v481_v32 = vpop.f32.mrb[17].mxu1 }
 0x220   :  { %v482_v33 = vadd.f32 %v481_v32, %v1500_v44  ;;  %696 = vmatprep.mubr.f32.mxu0 %v541_v28 }
 0x221   :  { %697 = vmatmul.mubr.f32.gmra.mrb[30].mxu0 %v540_v30  ;;  %v542_v36 = vmax.f32 %v480_v31, 0.0 }
 0x222   :  { %v543_v34 = vmax.f32 %v482_v33, 0.0  ;;  %v485_v35 = vpop.f32.mrb[18].mxu1 }
 0x223   :  { %v486_v37 = vadd.f32 %v485_v35, %v1498_v43  ;;  %v487_v38 = vpop.f32.mrb[19].mxu1 }
 0x224   :  { %v488_v39 = vadd.f32 %v487_v38, %v1500_v44  ;;  %701 = vmatprep.mubr.f32.mxu0 %v543_v34 }
 0x225   :  { %702 = vmatmul.mubr.f32.gmra.mrb[32].mxu0 %v542_v36  ;;  %v544_v42 = vmax.f32 %v486_v37, 0.0 }
 0x226   :  { %v545_v40 = vmax.f32 %v488_v39, 0.0  ;;  %v491_v41 = vpop.f32.mrb[20].mxu1 }
 0x227   :  { %v492_v45 = vadd.f32 %v491_v41, %v1498_v43  ;;  %v493_v46 = vpop.f32.mrb[21].mxu1 }
 0x228   :  { %v494_v47 = vadd.f32 %v493_v46, %v1500_v44  ;;  %706 = vmatprep.mubr.f32.mxu0 %v545_v40 }
 0x229   :  { %707 = vmatmul.mubr.f32.gmra.mrb[34].mxu0 %v544_v42  ;;  %v546_v50 = vmax.f32 %v492_v45, 0.0 }
 0x22a   :  { %v547_v48 = vmax.f32 %v494_v47, 0.0  ;;  %v497_v49 = vpop.f32.mrb[22].mxu1 }
 0x22b   :  { %v498_v51 = vadd.f32 %v497_v49, %v1498_v43  ;;  %v499_v52 = vpop.f32.mrb[23].mxu1 }
 0x22c   :  { %v500_v53 = vadd.f32 %v499_v52, %v1500_v44  ;;  %711 = vmatprep.mubr.f32.mxu0 %v547_v48 }
 0x22d   :  { %712 = vmatmul.mubr.f32.gmra.mrb[36].mxu0 %v546_v50  ;;  %v548_v56 = vmax.f32 %v498_v51, 0.0 }
 0x22e   :  { %v549_v54 = vmax.f32 %v500_v53, 0.0  ;;  %v503_v55 = vpop.f32.mrb[24].mxu1 }
 0x22f   :  { %v504_v57 = vadd.f32 %v503_v55, %v1498_v43  ;;  %v505_v58 = vpop.f32.mrb[25].mxu1 }
 0x230   :  { %v506_v59 = vadd.f32 %v505_v58, %v1500_v44  ;;  %716 = vmatprep.mubr.f32.mxu0 %v549_v54 }
 0x231   :  { %717 = vmatmul.mubr.f32.gmra.mrb[38].mxu0 %v548_v56  ;;  %v550_v62 = vmax.f32 %v504_v57, 0.0 }
 0x232   :  { %v551_v60 = vmax.f32 %v506_v59, 0.0  ;;  %v509_v61 = vpop.f32.mrb[26].mxu1 }
 0x233   :  { %v510_v63 = vadd.f32 %v509_v61, %v1498_v43  ;;  %v511_v0 = vpop.f32.mrb[27].mxu1 }
 0x234   :  { %v512_v1 = vadd.f32 %v511_v0, %v1500_v44  ;;  %721 = vmatprep.mubr.f32.mxu0 %v551_v60 }
 0x235   :  { %722 = vmatmul.mubr.f32.gmra.mrb[40].mxu0 %v550_v62  ;;  %v552_v5 = vmax.f32 %v510_v63, 0.0 }
 0x236   :  { %v553_v2 = vmax.f32 %v512_v1, 0.0  ;;  %v515_v4 = vpop.f32.mrb[28].mxu1 }
 0x237   :  { %v516_v6 = vadd.f32 %v515_v4, %v1498_v43  ;;  %v517_v7 = vpop.f32.mrb[29].mxu1 }
 0x238   :  { %v518_v8 = vadd.f32 %v517_v7, %v1500_v44  ;;  %726 = vmatprep.mubr.f32.mxu0 %v553_v2 }
 0x239   :  { %727 = vmatmul.mubr.f32.gmra.mrb[42].mxu0 %v552_v5  ;;  %v554_v11 = vmax.f32 %v516_v6, 0.0 }
 0x23a   :  { %v555_v9 = vmax.f32 %v518_v8, 0.0  ;;  %v521_v10 = vpop.f32.mrb[30].mxu1 }
 0x23b   :  { %v522_v12 = vadd.f32 %v521_v10, %v1498_v43  ;;  %v523_v13 = vpop.f32.mrb[31].mxu1  ;;  %v1284_v43 = vmov 0  }
 0x23c   :  { %v524_v14 = vadd.f32 %v523_v13, %v1500_v44  ;;  %731 = vmatprep.mubr.f32.mxu0 %v555_v9  ;;  %1154 = vset.pattern.permute.xlu0 %v1284_v43 }
 0x23d   :  { %732 = vmatmul.mubr.f32.gmra.mrb[44].mxu0 %v554_v11  ;;  %v556_v16 = vmax.f32 %v522_v12, 0.0  ;;  %762 = vperm.xlu0 %1154, %v759_v18  }
 0x23e   :  { %v557_v15 = vmax.f32 %v524_v14, 0.0 }
 0x240   :  { %736 = vmatprep.mubr.f32.mxu0 %v557_v15 }
 0x241   :  { %737 = vmatmul.mubr.f32.gmra.mrb[46].mxu0 %v556_v16 }
 0x2d8   :  { %v921_v44 = vpop.f32.mrb[16].mxu0 }
 0x2d9   :  { %v922_v19 = vpop.f32.mrb[17].mxu0 }
 0x2da   :  { %v923_v20 = vadd.f32 %v922_v19, %v921_v44 }
 0x2dc   :  { %v924_v22 = vpop.f32.mrb[18].mxu0  ;;  %v664_v24 = vadd.f32 %v923_v20, %v1542_v21 }
 0x2dd   :  { %v925_v23 = vpop.f32.mrb[19].mxu0 }
 0x2de   :  { %v926_v3 = vadd.f32 %v925_v23, %v924_v22  ;;  %v742_v28 = vmax.f32 %v664_v24, 0.0 }
 0x2e0   :  { %v669_v25 = vadd.f32 %v926_v3, %v1542_v21  ;;  %v927_v26 = vpop.f32.mrb[20].mxu0 }
 0x2e1   :  { %v928_v27 = vpop.f32.mrb[21].mxu0 }
 0x2e2   :  { %v743_v29 = vmax.f32 %v669_v25, 0.0  ;;  %v929_v30 = vadd.f32 %v928_v27, %v927_v26 }
 0x2e4   :  { %v1118_v31 = vpack.c.bf16 %v743_v29, %v742_v28  ;;  %v930_v32 = vpop.f32.mrb[22].mxu0  ;;  %v674_v34 = vadd.f32 %v929_v30, %v1542_v21 }
 0x2e5   :  { %v931_v33 = vpop.f32.mrb[23].mxu0 }
 0x2e6   :  { %v932_v35 = vadd.f32 %v931_v33, %v930_v32  ;;  %1119 = vmatpush3.bf16.xpose.msra.mxu1 %v1118_v31  ;;  %v744_v39 = vmax.f32 %v674_v34, 0.0 }
 0x2e7   :  { %1120 = vmatprep.subr.bf16.mxu1 %v1282_v17 }
 0x2e8   :  { %v679_v36 = vadd.f32 %v932_v35, %v1542_v21  ;;  %v933_v37 = vpop.f32.mrb[24].mxu0 }
 0x2e9   :  { %v934_v38 = vpop.f32.mrb[25].mxu0 }
 0x2ea   :  { %v745_v40 = vmax.f32 %v679_v36, 0.0  ;;  %v935_v41 = vadd.f32 %v934_v38, %v933_v37 }
 0x2ec   :  { %v1121_v42 = vpack.c.bf16 %v745_v40, %v744_v39  ;;  %v936_v45 = vpop.f32.mrb[26].mxu0  ;;  %v684_v47 = vadd.f32 %v935_v41, %v1542_v21 }
 0x2ed   :  { %v937_v46 = vpop.f32.mrb[27].mxu0 }
 0x2ee   :  { %v938_v48 = vadd.f32 %v937_v46, %v936_v45  ;;  %1122 = vmatpush3.bf16.xpose.msra.mxu1 %v1121_v42  ;;  %v746_v52 = vmax.f32 %v684_v47, 0.0  ;;  %v758_v46 = vld [vmem:[%s1589_s7] sm:$0xff]  ;;  %v763_v47 = vpop.permute.xlu0 %762 }
 0x2ef   :  { %1123 = vmatprep.subr.bf16.mxu1 %v1282_v17 }
 0x2f0   :  { %v689_v49 = vadd.f32 %v938_v48, %v1542_v21  ;;  %v939_v50 = vpop.f32.mrb[28].mxu0 }
 0x2f1   :  { %v940_v51 = vpop.f32.mrb[29].mxu0 }
 0x2f2   :  { %v747_v53 = vmax.f32 %v689_v49, 0.0  ;;  %v941_v54 = vadd.f32 %v940_v51, %v939_v50 }
 0x2f4   :  { %v1124_v55 = vpack.c.bf16 %v747_v53, %v746_v52  ;;  %v942_v56 = vpop.f32.mrb[30].mxu0  ;;  %v694_v58 = vadd.f32 %v941_v54, %v1542_v21 }
 0x2f5   :  { %v943_v57 = vpop.f32.mrb[31].mxu0 }
 0x2f6   :  { %v944_v59 = vadd.f32 %v943_v57, %v942_v56  ;;  %1125 = vmatpush3.bf16.xpose.msra.mxu1 %v1124_v55  ;;  %v748_v63 = vmax.f32 %v694_v58, 0.0 }
 0x2f7   :  { %1126 = vmatprep.subr.bf16.mxu1 %v1282_v17 }
 0x2f8   :  { %v699_v60 = vadd.f32 %v944_v59, %v1542_v21  ;;  %v945_v61 = vpop.f32.mrb[32].mxu0 }
 0x2f9   :  { %v946_v62 = vpop.f32.mrb[33].mxu0 }
 0x2fa   :  { %v749_v0 = vmax.f32 %v699_v60, 0.0  ;;  %v947_v1 = vadd.f32 %v946_v62, %v945_v61 }
 0x2fc   :  { %v1127_v2 = vpack.c.bf16 %v749_v0, %v748_v63  ;;  %v948_v4 = vpop.f32.mrb[34].mxu0  ;;  %v704_v6 = vadd.f32 %v947_v1, %v1542_v21 }
 0x2fd   :  { %v949_v5 = vpop.f32.mrb[35].mxu0 }
 0x2fe   :  { %v950_v7 = vadd.f32 %v949_v5, %v948_v4  ;;  %1128 = vmatpush3.bf16.xpose.msra.mxu1 %v1127_v2  ;;  %v750_v11 = vmax.f32 %v704_v6, 0.0 }
 0x2ff   :  { %1129 = vmatprep.subr.bf16.mxu1 %v1282_v17 }
 0x300   :  { %v709_v8 = vadd.f32 %v950_v7, %v1542_v21  ;;  %v951_v9 = vpop.f32.mrb[36].mxu0 }
 0x301   :  { %v952_v10 = vpop.f32.mrb[37].mxu0 }
 0x302   :  { %v751_v12 = vmax.f32 %v709_v8, 0.0  ;;  %v953_v13 = vadd.f32 %v952_v10, %v951_v9 }
 0x304   :  { %v1130_v14 = vpack.c.bf16 %v751_v12, %v750_v11  ;;  %v954_v15 = vpop.f32.mrb[38].mxu0  ;;  %v714_v18 = vadd.f32 %v953_v13, %v1542_v21 }
 0x305   :  { %v955_v16 = vpop.f32.mrb[39].mxu0 }
 0x306   :  { %v956_v43 = vadd.f32 %v955_v16, %v954_v15  ;;  %1131 = vmatpush3.bf16.xpose.msra.mxu1 %v1130_v14  ;;  %v752_v22 = vmax.f32 %v714_v18, 0.0 }
 0x307   :  { %1132 = vmatprep.subr.bf16.mxu1 %v1282_v17 }
 0x308   :  { %v719_v44 = vadd.f32 %v956_v43, %v1542_v21  ;;  %v957_v19 = vpop.f32.mrb[40].mxu0 }
 0x309   :  { %v958_v20 = vpop.f32.mrb[41].mxu0 }
 0x30a   :  { %v753_v23 = vmax.f32 %v719_v44, 0.0  ;;  %v959_v24 = vadd.f32 %v958_v20, %v957_v19 }
 0x30c   :  { %v1133_v3 = vpack.c.bf16 %v753_v23, %v752_v22  ;;  %v960_v25 = vpop.f32.mrb[42].mxu0  ;;  %v724_v27 = vadd.f32 %v959_v24, %v1542_v21 }
 0x30d   :  { %v961_v26 = vpop.f32.mrb[43].mxu0 }
 0x30e   :  { %v962_v28 = vadd.f32 %v961_v26, %v960_v25  ;;  %1134 = vmatpush3.bf16.xpose.msra.mxu1 %v1133_v3  ;;  %v754_v32 = vmax.f32 %v724_v27, 0.0 }
 0x30f   :  { %1135 = vmatprep.subr.bf16.mxu1 %v1282_v17 }
 0x310   :  { %v729_v29 = vadd.f32 %v962_v28, %v1542_v21  ;;  %v963_v30 = vpop.f32.mrb[44].mxu0 }
 0x311   :  { %v964_v31 = vpop.f32.mrb[45].mxu0 }
 0x312   :  { %v755_v33 = vmax.f32 %v729_v29, 0.0  ;;  %v965_v34 = vadd.f32 %v964_v31, %v963_v30 }
 0x314   :  { %v1136_v35 = vpack.c.bf16 %v755_v33, %v754_v32  ;;  %v966_v36 = vpop.f32.mrb[46].mxu0  ;;  %v734_v38 = vadd.f32 %v965_v34, %v1542_v21 }
 0x315   :  { %v967_v37 = vpop.f32.mrb[47].mxu0 }
 0x316   :  { %v968_v39 = vadd.f32 %v967_v37, %v966_v36  ;;  %1137 = vmatpush3.bf16.xpose.msra.mxu1 %v1136_v35  ;;  %v756_v41 = vmax.f32 %v734_v38, 0.0 }
 0x317   :  { %1138 = vmatprep.subr.bf16.mxu1 %v1282_v17 }
 0x318   :  { %v739_v40 = vadd.f32 %v968_v39, %v1542_v21 }
 0x31a   :  { %v757_v42 = vmax.f32 %v739_v40, 0.0 }
 0x31c   :  { %v1139_v45 = vpack.c.bf16 %v757_v42, %v756_v41 }
 0x31e   :  { %1140 = vmatpush3.bf16.xpose.msra.mxu1 %v1139_v45 }
 0x325   :  { %1047 = vmatmul.mubr.f32.vlgmr.msra.gmra.mrb[32].mxu1 %v758_v46 }
 0x3f8   :  { %v831_v48 = vpop.f32.mrb[32].mxu1 }
 0x3f9   :  { %v832_v49 = vadd.f32 %v831_v48, %v763_v47  ;;  %v1048_v50 = vpop.f32.mrb[33].mxu1 }
 0x3fb   :  { %835 = vst [vmem:[#allocation10] sm:$0xff] %v832_v49 }
 0x3fc   :  { %1254 = shalt.err (!%p1251_p8)
}
 0x3fd   :  { %s1255_s7 = scalar_lea.hbm %s1591_s9, 128 }
 0x3fe   :  { %p1256_p9 = scmp.ne.s32.totalorder %s1591_s9, %s1255_s7  ;;  %p1259_p10 = scmp.lt.u32.totalorder %s1255_s7, %s1591_s9 }
 0x400   :  { %p1261_p11 = pnand %p1259_p10, %p1256_p9 }
 0x402   :  { %1264 = shalt.err (!%p1261_p11)
}
 0x403   :  { %845 = dma.vmem_to_hbm [thread:$0]  %s843_s26, 128, %s1591_s9, [#allocation4]  }
 0x404   :  { %1271 = dma.done.wait [#allocation4], 128  }
 0x405   :  { %1272 = vsyncadd [#allocation4], 4294967168 }
 0x406   :  { %849 = vsyncpa [#allocation3], 1 }
 0x407   :  { %850 = vsyncpa [#allocation6], 1 }
 0x408   :  { %851 = vsyncpa [#allocation9], 1 }
 0x409   :  { %852 = vsyncpa [#allocation4], 1 }

</bundles_post_ra>
